<compile_context>
chip_gen: v7x
topology: tpu7x:2x2x1
jax: 0.10.0
libtpu: 0.0.40
codegen_flags: <defaults>
</compile_context>

<pallas_src>
import functools

import jax
import jax.numpy as jnp
from jax.experimental import pallas as pl
from jax.experimental.pallas import tpu as pltpu


def _round_up(x, m):
    return ((x + m - 1) // m) * m


def _mlp_softmax_kernel(x_ref, w1_ref, b1_ref, w2_ref, b2_ref, w3_ref, b3_ref,
                        o_ref):
    # x / all weights are bf16 -> MXU single-pass, f32 accumulation.
    x = x_ref[...]

    # Linear(in_dim -> 128) + ReLU   (bias/ReLU in f32: v5e VPU is f32-only)
    h1 = jnp.dot(x, w1_ref[...], preferred_element_type=jnp.float32)
    h1 = jnp.maximum(h1 + b1_ref[...], 0.0)

    # Linear(128 -> 64) + ReLU  (activations recast to bf16 for the MXU)
    h2 = jnp.dot(h1.astype(jnp.bfloat16), w2_ref[...],
                 preferred_element_type=jnp.float32)
    h2 = jnp.maximum(h2 + b2_ref[...], 0.0)

    # Linear(64 -> motion_num)
    logits = jnp.dot(h2.astype(jnp.bfloat16), w3_ref[...],
                     preferred_element_type=jnp.float32)
    logits = logits + b3_ref[...]

    # Numerically-stabilized softmax over the feature axis.
    m = jnp.max(logits, axis=-1, keepdims=True)
    e = jnp.exp(logits - m)
    inv = pl.reciprocal(jnp.sum(e, axis=-1, keepdims=True), approx=True)
    o_ref[...] = (e * inv).astype(o_ref.dtype)


@functools.partial(jax.jit, static_argnames=("block_rows",))
def motion_classifier_forward(x, params, *, block_rows=2048):
    """x: [B, in_dim] float32; params: dict of w1,b1,w2,b2,w3,b3 (f32).

    Returns softmax probabilities [B, motion_num] in float32.
    """
    B, in_dim = x.shape
    motion_num = params["w3"].shape[1]

    # Batch tile: multiple of 8 (sublane rule), capped at block_rows.
    # TB=2048 keeps per-step VMEM temporaries (h1/h2/logits etc.) a few MiB,
    # safely inside even v5e's 16 MiB scoped-VMEM default with double
    # buffering, while amortizing the ~0.35 us per-grid-step overhead.
    TB = min(block_rows, _round_up(max(B, 1), 8))
    Bp = _round_up(B, TB)
    x_p = jnp.pad(x, ((0, Bp - B), (0, 0))) if Bp != B else x

    # bf16 for every MXU operand (x + all weights); biases stay f32.
    x_bf = x_p.astype(jnp.bfloat16)
    w1 = params["w1"].astype(jnp.bfloat16)
    w2 = params["w2"].astype(jnp.bfloat16)
    w3 = params["w3"].astype(jnp.bfloat16)
    b1 = params["b1"].astype(jnp.float32)
    b2 = params["b2"].astype(jnp.float32)
    b3 = params["b3"].astype(jnp.float32)

    grid = (pl.cdiv(Bp, TB),)

    resident = lambda shape: pl.BlockSpec(shape, lambda i: (0, 0))

    out = pl.pallas_call(
        _mlp_softmax_kernel,
        out_shape=jax.ShapeDtypeStruct((Bp, motion_num), jnp.float32),
        grid=grid,
        in_specs=[
            pl.BlockSpec((TB, in_dim), lambda i: (i, 0)),   # x: streamed tiles
            resident(w1.shape),                              # weights/biases:
            resident(b1.shape),                              # DMA'd once,
            resident(w2.shape),                              # VMEM-resident
            resident(b2.shape),                              # across steps
            resident(w3.shape),
            resident(b3.shape),
        ],
        out_specs=pl.BlockSpec((TB, motion_num), lambda i: (i, 0)),
        compiler_params=pltpu.CompilerParams(
            dimension_semantics=("parallel",)),
    )(x_bf, w1, b1, w2, b2, w3, b3)

    return out[:B] if Bp != B else out


def init_params(key, in_dim=12, motion_num=2):
    """Mimic PyTorch default Linear init: U(-1/sqrt(fan_in), 1/sqrt(fan_in))."""
    dims = [(in_dim, 128), (128, 64), (64, motion_num)]
    params = {}
    for i, (fi, fo) in enumerate(dims, start=1):
        key, kw, kb = jax.random.split(key, 3)
        bound = 1.0 / jnp.sqrt(jnp.float32(fi))
        params[f"w{i}"] = jax.random.uniform(
            kw, (fi, fo), jnp.float32, minval=-bound, maxval=bound)
        params[f"b{i}"] = jax.random.uniform(
            kb, (1, fo), jnp.float32, minval=-bound, maxval=bound)
    return params


def _reference_forward(x, params):
    # Matches the kernel's mixed precision: bf16 MXU operands, f32 accumulate,
    # f32 bias/ReLU/softmax.
    bf = jnp.bfloat16
    h1 = jnp.dot(x.astype(bf), params["w1"].astype(bf),
                 preferred_element_type=jnp.float32)
    h1 = jnp.maximum(h1 + params["b1"], 0.0)
    h2 = jnp.dot(h1.astype(bf), params["w2"].astype(bf),
                 preferred_element_type=jnp.float32)
    h2 = jnp.maximum(h2 + params["b2"], 0.0)
    logits = jnp.dot(h2.astype(bf), params["w3"].astype(bf),
                     preferred_element_type=jnp.float32) + params["b3"]
    return jax.nn.softmax(logits, axis=-1)


if __name__ == "__main__":
    key = jax.random.PRNGKey(0)
    k_param, k_x1, k_x2 = jax.random.split(key, 3)

    in_dim, motion_num = 12, 2
    params = init_params(k_param, in_dim=in_dim, motion_num=motion_num)

    # Small single-tile case (B=8 -> one grid step).
    x = jax.random.normal(k_x1, (8, in_dim), jnp.float32)
    out = jax.block_until_ready(motion_classifier_forward(x, params))
    ref = _reference_forward(x, params)
    assert out.shape == (8, motion_num)
    assert jnp.allclose(out, ref, atol=5e-3, rtol=5e-3)
    assert jnp.allclose(jnp.sum(out, axis=-1), 1.0, atol=5e-3)

    # Ragged multi-tile case (B=37, TB=16 -> 3 grid steps + padded tail).
    x2 = jax.random.normal(k_x2, (37, in_dim), jnp.float32)
    out2 = jax.block_until_ready(
        motion_classifier_forward(x2, params, block_rows=16))
    ref2 = _reference_forward(x2, params)
    assert out2.shape == (37, motion_num)
    assert jnp.allclose(out2, ref2, atol=5e-3, rtol=5e-3)
    assert jnp.allclose(jnp.sum(out2, axis=-1), 1.0, atol=5e-3)

    print("KERNEL_OK")
</pallas_src>

<mosaic_0001>
module attributes {stable_mosaic.version = 11 : i64} {
  func.func @_mlp_softmax_kernel(%arg0: i32, %arg1: memref<8x12xbf16, #tpu.memory_space<vmem>>, %arg2: memref<12x128xbf16, #tpu.memory_space<vmem>>, %arg3: memref<1x128xf32, #tpu.memory_space<vmem>>, %arg4: memref<128x64xbf16, #tpu.memory_space<vmem>>, %arg5: memref<1x64xf32, #tpu.memory_space<vmem>>, %arg6: memref<64x2xbf16, #tpu.memory_space<vmem>>, %arg7: memref<1x2xf32, #tpu.memory_space<vmem>>, %arg8: memref<8x2xf32, #tpu.memory_space<vmem>>) attributes {dimension_semantics = [#tpu.dimension_semantics<parallel>], iteration_bounds = array<i64: 1>, scalar_prefetch = 0 : i64, scratch_operands = 0 : i64, tpu.core_type = #tpu.core_type<tc>, window_params = [{transform_indices = @transform_0, window_bounds = array<i64: 8, 12>}, {pipeline_mode = #tpu.pipeline_mode<synchronous>, transform_indices = @transform_1, window_bounds = array<i64: 12, 128>}, {pipeline_mode = #tpu.pipeline_mode<synchronous>, transform_indices = @transform_2, window_bounds = array<i64: 1, 128>}, {pipeline_mode = #tpu.pipeline_mode<synchronous>, transform_indices = @transform_3, window_bounds = array<i64: 128, 64>}, {pipeline_mode = #tpu.pipeline_mode<synchronous>, transform_indices = @transform_4, window_bounds = array<i64: 1, 64>}, {pipeline_mode = #tpu.pipeline_mode<synchronous>, transform_indices = @transform_5, window_bounds = array<i64: 64, 2>}, {pipeline_mode = #tpu.pipeline_mode<synchronous>, transform_indices = @transform_6, window_bounds = array<i64: 1, 2>}, {transform_indices = @transform_7, window_bounds = array<i64: 8, 2>}]} {
    %c0 = arith.constant 0 : index
    %c0_0 = arith.constant 0 : index
    %0 = vector.load %arg1[%c0, %c0_0] : memref<8x12xbf16, #tpu.memory_space<vmem>>, vector<8x12xbf16>
    %c0_1 = arith.constant 0 : index
    %c0_2 = arith.constant 0 : index
    %1 = vector.load %arg2[%c0_1, %c0_2] : memref<12x128xbf16, #tpu.memory_space<vmem>>, vector<12x128xbf16>
    %cst = arith.constant dense<0.000000e+00> : vector<8x128xf32>
    %2 = tpu.matmul %0, %1, %cst {dimension_numbers = #tpu.dot_dimension_numbers<[1], [0], [0], [1], [0, 0, 1, 1], [], []>} : vector<8x12xbf16>, vector<12x128xbf16>, vector<8x128xf32> -> vector<8x128xf32>
    %c0_3 = arith.constant 0 : index
    %c0_4 = arith.constant 0 : index
    %3 = vector.load %arg3[%c0_3, %c0_4] : memref<1x128xf32, #tpu.memory_space<vmem>>, vector<1x128xf32>
    %4 = vector.broadcast %3 : vector<1x128xf32> to vector<8x128xf32>
    %5 = arith.addf %2, %4 : vector<8x128xf32>
    %cst_5 = arith.constant 0.000000e+00 : f32
    %6 = vector.broadcast %cst_5 : f32 to vector<8x128xf32>
    %7 = arith.maximumf %5, %6 : vector<8x128xf32>
    %8 = arith.truncf %7 : vector<8x128xf32> to vector<8x128xbf16>
    %c0_6 = arith.constant 0 : index
    %c0_7 = arith.constant 0 : index
    %9 = vector.load %arg4[%c0_6, %c0_7] : memref<128x64xbf16, #tpu.memory_space<vmem>>, vector<128x64xbf16>
    %cst_8 = arith.constant dense<0.000000e+00> : vector<8x64xf32>
    %10 = tpu.matmul %8, %9, %cst_8 {dimension_numbers = #tpu.dot_dimension_numbers<[1], [0], [0], [1], [0, 0, 1, 1], [], []>} : vector<8x128xbf16>, vector<128x64xbf16>, vector<8x64xf32> -> vector<8x64xf32>
    %c0_9 = arith.constant 0 : index
    %c0_10 = arith.constant 0 : index
    %11 = vector.load %arg5[%c0_9, %c0_10] : memref<1x64xf32, #tpu.memory_space<vmem>>, vector<1x64xf32>
    %12 = vector.broadcast %11 : vector<1x64xf32> to vector<8x64xf32>
    %13 = arith.addf %10, %12 : vector<8x64xf32>
    %cst_11 = arith.constant 0.000000e+00 : f32
    %14 = vector.broadcast %cst_11 : f32 to vector<8x64xf32>
    %15 = arith.maximumf %13, %14 : vector<8x64xf32>
    %16 = arith.truncf %15 : vector<8x64xf32> to vector<8x64xbf16>
    %c0_12 = arith.constant 0 : index
    %c0_13 = arith.constant 0 : index
    %17 = vector.load %arg6[%c0_12, %c0_13] : memref<64x2xbf16, #tpu.memory_space<vmem>>, vector<64x2xbf16>
    %cst_14 = arith.constant dense<0.000000e+00> : vector<8x2xf32>
    %18 = tpu.matmul %16, %17, %cst_14 {dimension_numbers = #tpu.dot_dimension_numbers<[1], [0], [0], [1], [0, 0, 1, 1], [], []>} : vector<8x64xbf16>, vector<64x2xbf16>, vector<8x2xf32> -> vector<8x2xf32>
    %c0_15 = arith.constant 0 : index
    %c0_16 = arith.constant 0 : index
    %19 = vector.load %arg7[%c0_15, %c0_16] : memref<1x2xf32, #tpu.memory_space<vmem>>, vector<1x2xf32>
    %20 = vector.broadcast %19 : vector<1x2xf32> to vector<8x2xf32>
    %21 = arith.addf %18, %20 : vector<8x2xf32>
    %cst_17 = arith.constant dense<0xFF800000> : vector<8xf32>
    %22 = vector.multi_reduction <maximumf>, %21, %cst_17 [1] : vector<8x2xf32> to vector<8xf32>
    %23 = vector.shape_cast %22 : vector<8xf32> to vector<8x1xf32>
    %24 = vector.broadcast %23 : vector<8x1xf32> to vector<8x2xf32>
    %25 = arith.subf %21, %24 : vector<8x2xf32>
    %26 = math.exp %25 : vector<8x2xf32>
    %cst_18 = arith.constant dense<0.000000e+00> : vector<8xf32>
    %27 = vector.multi_reduction <add>, %26, %cst_18 [1] : vector<8x2xf32> to vector<8xf32>
    %28 = vector.shape_cast %27 : vector<8xf32> to vector<8x1xf32>
    %29 = tpu.reciprocal %28 {approx = true} : vector<8x1xf32> -> vector<8x1xf32>
    %30 = vector.broadcast %29 : vector<8x1xf32> to vector<8x2xf32>
    %31 = arith.mulf %26, %30 : vector<8x2xf32>
    %c0_19 = arith.constant 0 : index
    %c0_20 = arith.constant 0 : index
    %32 = vector.load %arg8[%c0_19, %c0_20] : memref<8x2xf32, #tpu.memory_space<vmem>>, vector<8x2xf32>
    tpu.vector_store %arg8[%c0_19, %c0_20], %31 {strides = array<i32>} : memref<8x2xf32, #tpu.memory_space<vmem>>, vector<8x2xf32>,
    return
  }
  func.func @transform_0(%arg0: i32) -> (i32, i32) {
    %c0_i32 = arith.constant 0 : i32
    %c0_i32_0 = arith.constant 0 : i32
    return %arg0, %c0_i32 : i32, i32
  }
  func.func @transform_1(%arg0: i32) -> (i32, i32) {
    %c0_i32 = arith.constant 0 : i32
    %c0_i32_0 = arith.constant 0 : i32
    %c0_i32_1 = arith.constant 0 : i32
    return %c0_i32, %c0_i32_0 : i32, i32
  }
  func.func @transform_2(%arg0: i32) -> (i32, i32) {
    %c0_i32 = arith.constant 0 : i32
    %c0_i32_0 = arith.constant 0 : i32
    %c0_i32_1 = arith.constant 0 : i32
    return %c0_i32, %c0_i32_0 : i32, i32
  }
  func.func @transform_3(%arg0: i32) -> (i32, i32) {
    %c0_i32 = arith.constant 0 : i32
    %c0_i32_0 = arith.constant 0 : i32
    %c0_i32_1 = arith.constant 0 : i32
    return %c0_i32, %c0_i32_0 : i32, i32
  }
  func.func @transform_4(%arg0: i32) -> (i32, i32) {
    %c0_i32 = arith.constant 0 : i32
    %c0_i32_0 = arith.constant 0 : i32
    %c0_i32_1 = arith.constant 0 : i32
    return %c0_i32, %c0_i32_0 : i32, i32
  }
  func.func @transform_5(%arg0: i32) -> (i32, i32) {
    %c0_i32 = arith.constant 0 : i32
    %c0_i32_0 = arith.constant 0 : i32
    %c0_i32_1 = arith.constant 0 : i32
    return %c0_i32, %c0_i32_0 : i32, i32
  }
  func.func @transform_6(%arg0: i32) -> (i32, i32) {
    %c0_i32 = arith.constant 0 : i32
    %c0_i32_0 = arith.constant 0 : i32
    %c0_i32_1 = arith.constant 0 : i32
    return %c0_i32, %c0_i32_0 : i32, i32
  }
  func.func @transform_7(%arg0: i32) -> (i32, i32) {
    %c0_i32 = arith.constant 0 : i32
    %c0_i32_0 = arith.constant 0 : i32
    return %arg0, %c0_i32 : i32, i32
  }
}

</mosaic_0001>

<bundles_post_ra>
// kernel: motion_classifier_forward.1
= control target key start
LH: loop header
LB: loop body
LE: loop exit
PB: predicated region body
PF: predicated region fallthrough
CT: control target
= control target key end

     0   :  { %vm46_vm0 = vcmask 1045504   ;;  %v396_v0 = vmov 0.0   ;;  %vm397_vm1 = vmmov 0   ;;  %vm42_vm2 = vcmask 97280   ;;  %s498_s1 = inlined_call_operand.vmem [shape: bf16[12,128], index: 1, kind: input, shape index: {}]   ;;  %s499_s3 = inlined_call_operand.vmem [shape: bf16[128,64], index: 3, kind: input, shape index: {}]   ;;  %s500_s0 = inlined_call_operand.vmem [shape: bf16[8,12], index: 0, kind: input, shape index: {}]   ;;  %s501_s5 = inlined_call_operand.vmem [shape: bf16[64,2], index: 5, kind: input, shape index: {}]   ;;  %s502_s2 = inlined_call_operand.vmem [shape: f32[1,128], index: 2, kind: input, shape index: {}]   ;;  %s503_s4 = inlined_call_operand.vmem [shape: f32[1,64], index: 4, kind: input, shape index: {}]   ;;  %s504_s6 = inlined_call_operand.vmem [shape: f32[1,2], index: 6, kind: input, shape index: {}]   ;;  %s505_s7 = inlined_call_operand.vmem [shape: f32[8,2], index: 7, kind: output, shape index: {}]  }
   0x1   :  { %339 = vmatprep.subr.bf16.mxu0 %v396_v0  ;;  %v379_v1 = vld [vmem:[%s498_s1] sm:$0x3f]   ;;  %341 = vmatprep.mubr.msk.bf16.mxu0 %vm397_vm1, %v396_v0  ;;  %v381_v5 = vld [vmem:[%s499_s3 + $0x8] sm:$0xff]   ;;  %v382_v6 = vld [vmem:[%s499_s3 + $0x10] sm:$0xff]   ;;  %vm244_vm3 = vcmask 523264   ;;  %vm288_vm4 = vcmask 15360  }
   0x2   :  { %345 = vmatprep.subr.bf16.mxu1 %v396_v0  ;;  %361 = vmatprep.mubr.msk.bf16.mxu1 %vm397_vm1, %v396_v0  ;;  %v48_v2 = vsel %vm46_vm0, %v379_v1, 0  ;;  %v380_v3 = vld [vmem:[%s499_s3] sm:$0xff]   ;;  %v383_v7 = vld [vmem:[%s499_s3 + $0x18] sm:$0xff]   ;;  %v385_v9 = vld [vmem:[%s499_s3 + $0x28] sm:$0xff]  }
   0x3   :  { %340 = vmatpush3.bf16.msra.mxu0 %v48_v2  ;;  %v27_v4 = vld [vmem:[%s500_s0] sm:$0xf]  ;;  %346 = vmatpush3.bf16.msra.mxu1 %v380_v3  ;;  %v386_v10 = vld [vmem:[%s499_s3 + $0x30] sm:$0xff]   ;;  %v387_v11 = vld [vmem:[%s499_s3 + $0x38] sm:$0xff]  }
   0x4   :  { %365 = vmatprep.subr.bf16.mxu0 %v396_v0  ;;  %347 = vmatprep.subr.bf16.mxu1 %v396_v0  ;;  %v384_v8 = vld [vmem:[%s499_s3 + $0x20] sm:$0xff]   ;;  %v389_v13 = vld [vmem:[%s501_s5 + $0x8] sm:$0xff]   ;;  %v390_v22 = vld [vmem:[%s501_s5 + $0x10] sm:$0xff]  }
   0x5   :  { %v388_v12 = vld [vmem:[%s501_s5] sm:$0xff]   ;;  %v391_v23 = vld [vmem:[%s501_s5 + $0x18] sm:$0xff]  }
   0x6   :  { %342 = vmatmul.mubr.msk.bf16.vlgmr.msra.gmra.mrb[0].mxu0 %vm42_vm2, %v27_v4  ;;  %v305_v14 = vld [vmem:[%s502_s2] ss:$0 sm:$0xff] }
   0x7   :  { %373 = vmatprep.mubr.msk.bf16.mxu0 %vm397_vm1, %v396_v0  ;;  %348 = vmatpush3.bf16.msra.mxu1 %v381_v5  ;;  %v308_v24 = vld [vmem:[%s503_s4] ss:$0 sm:$0xff] }
   0x8   :  { %349 = vmatprep.subr.bf16.mxu1 %v396_v0  ;;  %366 = vmatpush3.bf16.msra.mxu0 %v388_v12  ;;  %v317_v32 = vld [vmem:[%s504_s6] ss:$0 sm:$0xff] }
   0x9   :  { %367 = vmatprep.subr.bf16.mxu0 %v396_v0 }
   0xb   :  { %350 = vmatpush3.bf16.msra.mxu1 %v382_v6 }
   0xc   :  { %351 = vmatprep.subr.bf16.mxu1 %v396_v0  ;;  %368 = vmatpush3.bf16.msra.mxu0 %v389_v13 }
   0xd   :  { %369 = vmatprep.subr.bf16.mxu0 %v396_v0 }
   0xf   :  { %352 = vmatpush3.bf16.msra.mxu1 %v383_v7 }
  0x10   :  { %353 = vmatprep.subr.bf16.mxu1 %v396_v0  ;;  %370 = vmatpush3.bf16.msra.mxu0 %v390_v22 }
  0x11   :  { %371 = vmatprep.subr.bf16.mxu0 %v396_v0 }
  0x13   :  { %354 = vmatpush3.bf16.msra.mxu1 %v384_v8 }
  0x14   :  { %355 = vmatprep.subr.bf16.mxu1 %v396_v0  ;;  %372 = vmatpush3.bf16.msra.mxu0 %v391_v23 }
  0x17   :  { %356 = vmatpush3.bf16.msra.mxu1 %v385_v9 }
  0x18   :  { %357 = vmatprep.subr.bf16.mxu1 %v396_v0 }
  0x1b   :  { %358 = vmatpush3.bf16.msra.mxu1 %v386_v10 }
  0x1c   :  { %359 = vmatprep.subr.bf16.mxu1 %v396_v0 }
  0x1f   :  { %360 = vmatpush3.bf16.msra.mxu1 %v387_v11 }
  0xd9   :  { %v84_v15 = vpop.f32.mrb[0].mxu0 }
  0xda   :  { %v85_v16 = vadd.f32 %v305_v14, %v84_v15  ;;  %v343_v17 = vpop.f32.mrb[1].mxu0 }
  0xdb   :  { %v87_v18 = vpop.f32.mrb[2].mxu0 }
  0xdc   :  { %v90_v19 = vmax.f32 %v85_v16, 0.0  ;;  %v344_v20 = vpop.f32.mrb[3].mxu0 }
  0xde   :  { %v91_v21 = vpack.c.bf16 %v90_v19, %v90_v19 }
  0xe0   :  { %362 = vmatmul.mubr.bf16.vlgmr.msra.gmra.mrb[0].mxu1 %v91_v21 }
 0x1b3   :  { %v197_v25 = vpop.f32.mrb[0].mxu1 }
 0x1b4   :  { %v198_v26 = vadd.f32 %v308_v24, %v197_v25  ;;  %v363_v27 = vpop.f32.mrb[1].mxu1 }
 0x1b5   :  { %v200_v28 = vpop.f32.mrb[2].mxu1 }
 0x1b6   :  { %v203_v29 = vmax.f32 %v198_v26, 0.0  ;;  %v364_v30 = vpop.f32.mrb[3].mxu1 }
 0x1b8   :  { %v204_v31 = vpack.c.bf16 %v203_v29, %v203_v29 }
 0x1ba   :  { %374 = vmatmul.mubr.msk.bf16.vlgmr.msra.gmra.mrb[4].mxu0 %vm244_vm3, %v204_v31 }
 0x28d   :  { %v282_v33 = vpop.f32.mrb[4].mxu0 }
 0x28e   :  { %v283_v34 = vadd.f32 %v317_v32, %v282_v33  ;;  %v375_v35 = vpop.f32.mrb[5].mxu0 }
 0x28f   :  { %v285_v36 = vpop.f32.mrb[6].mxu0 }
 0x290   :  { %v376_v37 = vpop.f32.mrb[7].mxu0  ;;  %v289_v38 = vsel %vm288_vm4, %v283_v34, -inf }
 0x291   :  { %290 = vmax.xlane.f32.xlu0 %v289_v38 }
 0x31e   :  { %v291_v39 = vpop.xlane.xlu0 %290 }
 0x31f   :  { %v292_v40 = vsub.f32 %v283_v34, %v291_v39 }
 0x321   :  { %v293_v41 = vmul.f32 1.442695, %v292_v40 }
 0x323   :  { %392 = vpow2.f32 %v293_v41 }
 0x32d   :  { %v393_v42 = vpop.eup %392 }
 0x32e   :  { %v295_v43 = vsel %vm288_vm4, %v393_v42, 0.0 }
 0x32f   :  { %296 = vadd.xlane.f32.xlu0 %v295_v43 }
 0x3bc   :  { %v297_v44 = vpop.xlane.xlu0 %296 }
 0x3bd   :  { %394 = vrcp.f32 %v297_v44 }
 0x3c7   :  { %v395_v45 = vpop.eup %394 }
 0x3c8   :  { %v299_v46 = vmul.f32 %v395_v45, %v393_v42 }
 0x3ca   :  { %300 = vst.msk [vmem:[%s505_s7] sm:$0xff] %vm288_vm4, %v299_v46 }

</bundles_post_ra>
